<compile_context>
chip_gen: v7x
topology: tpu7x:2x2x1
jax: 0.10.0
libtpu: 0.0.40
codegen_flags: <defaults>
</compile_context>

<pallas_src>
import functools

import jax
import jax.numpy as jnp
import numpy as np
from jax.experimental import pallas as pl
from jax.experimental.pallas import tpu as pltpu


def _onehot_bf16(cond):
    # bool -> f32 -> bf16 (both casts are well-trodden Mosaic paths); 0/1 is exact in bf16.
    return cond.astype(jnp.float32).astype(jnp.bfloat16)


def adaptive_gcn_kernel(x_ref, row_ref, col_ref, colT_ref, u_ref,
                        ln_gr_ref, ln_gj_ref, ln_br_ref, ln_bj_ref,
                        w1r_ref, w1j_ref, b1_ref, w2_ref, b2_ref,
                        wg_ref, bg_ref, out_ref, *, n_nodes, n_edges):
    f32, bf16 = jnp.float32, jnp.bfloat16
    c_in = x_ref.shape[1]

    x = x_ref[...]                  # [N, C]  f32
    row = row_ref[...]              # [E, 1]  int32 (source)
    col = col_ref[...]              # [E, 1]  int32 (target)
    colT = colT_ref[...]            # [1, E]  int32 (target, lane-major for the scatter)

    # ---- one-hots, built ONCE each and reused (3 E*N compares total).
    e_iota = jax.lax.broadcasted_iota(jnp.int32, (n_edges, n_nodes), 1)     # [E, N]
    row_oh = _onehot_bf16(e_iota == row)      # [E, N]  used for x[row] AND z[row] gathers
    col_oh = _onehot_bf16(e_iota == col)      # [E, N]  used for x[col] gather
    n_iota = jax.lax.broadcasted_iota(jnp.int32, (n_nodes, n_edges), 0)     # [N, E]
    scat = _onehot_bf16(n_iota == colT)       # [N, E]  scatter-to-target, pre-transposed
                                              #         (every scatter contracts over its LAST dim)

    # ---- exact-f32 endpoint gather at 3 bf16 MXU passes (HIGH-equivalent, done by hand):
    #      the one-hot side is exact in bf16, so only x needs the 3-way bf16 split.
    x_hi = x.astype(bf16)
    r1 = x - x_hi.astype(f32)
    x_mid = r1.astype(bf16)
    x_lo = (r1 - x_mid.astype(f32)).astype(bf16)

    def gather_f32(oh):             # [E, N] bf16 one-hot -> x[idx] exactly, in f32
        return (jnp.dot(oh, x_hi, preferred_element_type=f32)
                + jnp.dot(oh, x_mid, preferred_element_type=f32)
                + jnp.dot(oh, x_lo, preferred_element_type=f32))

    x_i = gather_f32(row_oh)        # [E, C]
    x_j = gather_f32(col_oh)        # [E, C]
    # TODO(synk): at non-toy E/N replace the one-hot gather with an SMEM-prefetched index list + pltpu.make_async_copy row-gather (edge-tiled, double-buffered) so this becomes a memory stream.

    # ---- LayerNorm over the concatenated 2C features WITHOUT materializing the concat
    #      (torch defaults: biased variance, eps=1e-5).  Params are split into halves.
    two_c = 2.0 * c_in
    mean = (jnp.sum(x_i, axis=1, keepdims=True)
            + jnp.sum(x_j, axis=1, keepdims=True)) / two_c
    xc_i = x_i - mean
    xc_j = x_j - mean
    var = (jnp.sum(xc_i * xc_i, axis=1, keepdims=True)
           + jnp.sum(xc_j * xc_j, axis=1, keepdims=True)) / two_c
    rstd = jax.lax.rsqrt(var + 1e-5)
    xn_i = xc_i * rstd * ln_gr_ref[...] + ln_br_ref[...]
    xn_j = xc_j * rstd * ln_gj_ref[...] + ln_bj_ref[...]

    # ---- neighbor_selector MLP (f32): Linear(2C,64) -> ReLU -> Linear(64,1) -> Sigmoid.
    #      Linear(2C,64) is done as two half-width matmuls (w1 split in the wrapper).
    h = jnp.maximum(
        jnp.dot(xn_i, w1r_ref[...], preferred_element_type=f32)
        + jnp.dot(xn_j, w1j_ref[...], preferred_element_type=f32)
        + b1_ref[...], 0.0)
    score = jax.nn.sigmoid(
        jnp.dot(h, w2_ref[...], preferred_element_type=f32) + b2_ref[...])   # [E, 1]
    mask = (u_ref[...] < score).astype(f32)                                  # [E, 1]

    # ---- degrees with self loops; 0/1 operands exact in bf16, f32 accumulation.
    deg = 1.0 + jnp.dot(scat, mask.astype(bf16), preferred_element_type=f32)  # [N, 1]
    dinv = jax.lax.rsqrt(deg)                                                 # D^-1/2

    # ---- GCN aggregation in C_in space (W applied once at the end, by linearity):
    #      agg[i] = dinv[i]*x[i] + sum_e mask_e * [col_e == i] * dinv[row_e] * x[row_e]
    z = dinv * x                                                              # [N, C] f32
    zr = jnp.dot(row_oh, z.astype(bf16), preferred_element_type=f32)          # [E, C] (reuse row_oh)
    agg = z + jnp.dot(scat, (mask * zr).astype(bf16), preferred_element_type=f32)   # [N, C]

    # ---- final projection: DEFAULT bf16 matmul, f32 accumulate.  wg/bg are zero-padded to a
    #      128-lane multiple by the wrapper so this store is lane-dense (no masked vst).
    out = dinv * jnp.dot(agg.astype(bf16), wg_ref[...], preferred_element_type=f32) + bg_ref[...]
    out_ref[...] = out.astype(out_ref.dtype)


def adaptive_gcn_layer(x, edge_index, u, params):
    n_nodes, c_in = x.shape
    n_edges = edge_index.shape[1]
    c_out = params["wg"].shape[1]
    c_out_pad = ((c_out + 127) // 128) * 128        # lane-dense output width

    row = edge_index[0].reshape(n_edges, 1).astype(jnp.int32)
    col = edge_index[1].reshape(n_edges, 1).astype(jnp.int32)
    colT = edge_index[1].reshape(1, n_edges).astype(jnp.int32)

    xf = x.astype(jnp.float32)

    # Split LayerNorm / first-Linear params into x_i / x_j halves -> no lane concat in-kernel.
    ln_gr, ln_gj = params["ln_g"][:, :c_in], params["ln_g"][:, c_in:]
    ln_br, ln_bj = params["ln_b"][:, :c_in], params["ln_b"][:, c_in:]
    w1r, w1j = params["w1"][:c_in, :], params["w1"][c_in:, :]

    # bf16 weights for the DEFAULT-precision final projection; padded to 128 lanes.
    wg_pad = jnp.zeros((c_in, c_out_pad), jnp.bfloat16).at[:, :c_out].set(
        params["wg"].astype(jnp.bfloat16))
    bg_pad = jnp.zeros((1, c_out_pad), jnp.float32).at[:, :c_out].set(params["bg"])

    args = (xf, row, col, colT, u.reshape(n_edges, 1).astype(jnp.float32),
            ln_gr, ln_gj, ln_br, ln_bj, w1r, w1j,
            params["b1"], params["w2"], params["b2"], wg_pad, bg_pad)

    # Advisory cost estimate so XLA can schedule around the custom call.
    macs = (6 * n_edges * n_nodes * c_in                      # two exact endpoint gathers (3 passes each)
            + n_edges * 2 * c_in * 64 + n_edges * 64          # selector MLP
            + n_nodes * n_edges * (1 + 2 * c_in)              # deg + z[row] gather + agg scatter
            + n_nodes * c_in * c_out_pad)                     # final projection
    bytes_accessed = int(sum(int(a.size) * a.dtype.itemsize for a in args)
                         + n_nodes * c_out_pad * 4)
    cost = pl.CostEstimate(flops=int(2 * macs),
                           transcendentals=int(3 * n_edges + n_nodes),
                           bytes_accessed=bytes_accessed)

    # TODO(synk): for non-toy E/N add the edge-tiled two-phase grid (mask+deg, then aggregate) with PrefetchScalarGridSpec-prefetched row/col, dimension_semantics=("parallel",...,"arbitrary") for v7x megacore, 256/128-aligned tiles and per-chip vmem_limit_bytes.
    vmem = pl.BlockSpec(memory_space=pltpu.MemorySpace.VMEM)
    out = pl.pallas_call(
        functools.partial(adaptive_gcn_kernel, n_nodes=n_nodes, n_edges=n_edges),
        out_shape=jax.ShapeDtypeStruct((n_nodes, c_out_pad), jnp.float32),
        in_specs=[vmem] * len(args),
        out_specs=vmem,
        cost_estimate=cost,
    )(*args)
    return out[:, :c_out]


def reference(x, edge_index, u, params):
    """Plain-JAX (f32-accurate) reference mirroring the PyTorch forward, same bernoulli draws."""
    HI = jax.lax.Precision.HIGHEST
    row, col = edge_index[0], edge_index[1]
    xc = jnp.concatenate([x[row], x[col]], axis=1)
    mean = xc.mean(axis=1, keepdims=True)
    var = ((xc - mean) ** 2).mean(axis=1, keepdims=True)
    xn = (xc - mean) / jnp.sqrt(var + 1e-5) * params["ln_g"] + params["ln_b"]
    h = jnp.maximum(jnp.dot(xn, params["w1"], precision=HI) + params["b1"], 0.0)
    score = jax.nn.sigmoid(jnp.dot(h, params["w2"], precision=HI) + params["b2"])
    mask = (u.reshape(-1, 1) < score).astype(jnp.float32)[:, 0]
    n = x.shape[0]
    A = jnp.zeros((n, n), jnp.float32).at[col, row].add(mask)
    A_hat = A + jnp.eye(n, dtype=jnp.float32)
    dinv = 1.0 / jnp.sqrt(A_hat.sum(axis=1))
    A_norm = dinv[:, None] * A_hat * dinv[None, :]
    return jnp.dot(A_norm, jnp.dot(x, params["wg"], precision=HI),
                   precision=HI) + params["bg"]


def init_params(key, c_in, c_out):
    ks = jax.random.split(key, 6)
    two_c = 2 * c_in
    return {
        "ln_g": jnp.ones((1, two_c), jnp.float32),
        "ln_b": jnp.zeros((1, two_c), jnp.float32),
        "w1": jax.random.normal(ks[0], (two_c, 64), jnp.float32) * (1.0 / np.sqrt(two_c)),
        "b1": jax.random.normal(ks[1], (1, 64), jnp.float32) * 0.01,
        "w2": jax.random.normal(ks[2], (64, 1), jnp.float32) * (1.0 / 8.0),
        "b2": jax.random.normal(ks[3], (1, 1), jnp.float32) * 0.01,
        "wg": jax.random.normal(ks[4], (c_in, c_out), jnp.float32) * (1.0 / np.sqrt(c_in)),
        "bg": jax.random.normal(ks[5], (1, c_out), jnp.float32) * 0.01,
    }


if __name__ == "__main__":
    N, C_IN, C_OUT, E = 16, 8, 16, 32

    key = jax.random.PRNGKey(0)
    k_x, k_e, k_u, k_p = jax.random.split(key, 4)

    x = jax.random.normal(k_x, (N, C_IN), jnp.float32)
    edge_index = jax.random.randint(k_e, (2, E), 0, N, dtype=jnp.int32)
    u = jax.random.uniform(k_u, (E,), jnp.float32)   # bernoulli draws (shared with reference)
    params = init_params(k_p, C_IN, C_OUT)

    out = adaptive_gcn_layer(x, edge_index, u, params)
    out = jax.block_until_ready(out)

    ref = reference(x, edge_index, u, params)
    assert out.shape == (N, C_OUT)
    # Score/mask path is exact-f32 (manual 3-way bf16 split on the gather) so the bernoulli
    # realization matches the reference; aggregation + final projection use DEFAULT bf16
    # matmuls with f32 accumulation, covered by the tolerance below.
    np.testing.assert_allclose(np.asarray(out), np.asarray(ref), rtol=2e-2, atol=5e-2)
    print("KERNEL_OK")
</pallas_src>

<mosaic_0001>
module attributes {stable_mosaic.version = 11 : i64} {
  func.func @adaptive_gcn_kernel(%arg0: memref<16x8xf32, #tpu.memory_space<vmem>>, %arg1: memref<32x1xi32, #tpu.memory_space<vmem>>, %arg2: memref<32x1xi32, #tpu.memory_space<vmem>>, %arg3: memref<1x32xi32, #tpu.memory_space<vmem>>, %arg4: memref<32x1xf32, #tpu.memory_space<vmem>>, %arg5: memref<1x8xf32, #tpu.memory_space<vmem>>, %arg6: memref<1x8xf32, #tpu.memory_space<vmem>>, %arg7: memref<1x8xf32, #tpu.memory_space<vmem>>, %arg8: memref<1x8xf32, #tpu.memory_space<vmem>>, %arg9: memref<8x64xf32, #tpu.memory_space<vmem>>, %arg10: memref<8x64xf32, #tpu.memory_space<vmem>>, %arg11: memref<1x64xf32, #tpu.memory_space<vmem>>, %arg12: memref<64x1xf32, #tpu.memory_space<vmem>>, %arg13: memref<1x1xf32, #tpu.memory_space<vmem>>, %arg14: memref<8x128xbf16, #tpu.memory_space<vmem>>, %arg15: memref<1x128xf32, #tpu.memory_space<vmem>>, %arg16: memref<16x128xf32, #tpu.memory_space<vmem>>) attributes {dimension_semantics = [], scalar_prefetch = 0 : i64, scratch_operands = 0 : i64, tpu.core_type = #tpu.core_type<tc>} {
    %c0 = arith.constant 0 : index
    %c0_0 = arith.constant 0 : index
    %0 = vector.load %arg0[%c0, %c0_0] : memref<16x8xf32, #tpu.memory_space<vmem>>, vector<16x8xf32>
    %c0_1 = arith.constant 0 : index
    %c0_2 = arith.constant 0 : index
    %1 = vector.load %arg1[%c0_1, %c0_2] : memref<32x1xi32, #tpu.memory_space<vmem>>, vector<32x1xi32>
    %c0_3 = arith.constant 0 : index
    %c0_4 = arith.constant 0 : index
    %2 = vector.load %arg2[%c0_3, %c0_4] : memref<32x1xi32, #tpu.memory_space<vmem>>, vector<32x1xi32>
    %c0_5 = arith.constant 0 : index
    %c0_6 = arith.constant 0 : index
    %3 = vector.load %arg3[%c0_5, %c0_6] : memref<1x32xi32, #tpu.memory_space<vmem>>, vector<1x32xi32>
    %4 = tpu.iota {dimensions = array<i32: 1>} : vector<32x16xi32>
    %5 = vector.broadcast %1 : vector<32x1xi32> to vector<32x16xi32>
    %6 = arith.cmpi eq, %4, %5 : vector<32x16xi32>
    %7 = arith.extui %6 : vector<32x16xi1> to vector<32x16xi32>
    %8 = arith.sitofp %7 : vector<32x16xi32> to vector<32x16xf32>
    %9 = arith.truncf %8 : vector<32x16xf32> to vector<32x16xbf16>
    %10 = vector.broadcast %2 : vector<32x1xi32> to vector<32x16xi32>
    %11 = arith.cmpi eq, %4, %10 : vector<32x16xi32>
    %12 = arith.extui %11 : vector<32x16xi1> to vector<32x16xi32>
    %13 = arith.sitofp %12 : vector<32x16xi32> to vector<32x16xf32>
    %14 = arith.truncf %13 : vector<32x16xf32> to vector<32x16xbf16>
    %15 = tpu.iota {dimensions = array<i32: 0>} : vector<16x32xi32>
    %16 = vector.broadcast %3 : vector<1x32xi32> to vector<16x32xi32>
    %17 = arith.cmpi eq, %15, %16 : vector<16x32xi32>
    %18 = arith.extui %17 : vector<16x32xi1> to vector<16x32xi32>
    %19 = arith.sitofp %18 : vector<16x32xi32> to vector<16x32xf32>
    %20 = arith.truncf %19 : vector<16x32xf32> to vector<16x32xbf16>
    %21 = arith.truncf %0 : vector<16x8xf32> to vector<16x8xbf16>
    %22 = arith.extf %21 : vector<16x8xbf16> to vector<16x8xf32>
    %23 = arith.subf %0, %22 : vector<16x8xf32>
    %24 = arith.truncf %23 : vector<16x8xf32> to vector<16x8xbf16>
    %25 = arith.extf %24 : vector<16x8xbf16> to vector<16x8xf32>
    %26 = arith.subf %23, %25 : vector<16x8xf32>
    %27 = arith.truncf %26 : vector<16x8xf32> to vector<16x8xbf16>
    %cst = arith.constant dense<0.000000e+00> : vector<32x8xf32>
    %28 = tpu.matmul %9, %21, %cst {dimension_numbers = #tpu.dot_dimension_numbers<[1], [0], [0], [1], [0, 0, 1, 1], [], []>} : vector<32x16xbf16>, vector<16x8xbf16>, vector<32x8xf32> -> vector<32x8xf32>
    %cst_7 = arith.constant dense<0.000000e+00> : vector<32x8xf32>
    %29 = tpu.matmul %9, %24, %cst_7 {dimension_numbers = #tpu.dot_dimension_numbers<[1], [0], [0], [1], [0, 0, 1, 1], [], []>} : vector<32x16xbf16>, vector<16x8xbf16>, vector<32x8xf32> -> vector<32x8xf32>
    %30 = arith.addf %28, %29 : vector<32x8xf32>
    %cst_8 = arith.constant dense<0.000000e+00> : vector<32x8xf32>
    %31 = tpu.matmul %9, %27, %cst_8 {dimension_numbers = #tpu.dot_dimension_numbers<[1], [0], [0], [1], [0, 0, 1, 1], [], []>} : vector<32x16xbf16>, vector<16x8xbf16>, vector<32x8xf32> -> vector<32x8xf32>
    %32 = arith.addf %30, %31 : vector<32x8xf32>
    %cst_9 = arith.constant dense<0.000000e+00> : vector<32x8xf32>
    %33 = tpu.matmul %14, %21, %cst_9 {dimension_numbers = #tpu.dot_dimension_numbers<[1], [0], [0], [1], [0, 0, 1, 1], [], []>} : vector<32x16xbf16>, vector<16x8xbf16>, vector<32x8xf32> -> vector<32x8xf32>
    %cst_10 = arith.constant dense<0.000000e+00> : vector<32x8xf32>
    %34 = tpu.matmul %14, %24, %cst_10 {dimension_numbers = #tpu.dot_dimension_numbers<[1], [0], [0], [1], [0, 0, 1, 1], [], []>} : vector<32x16xbf16>, vector<16x8xbf16>, vector<32x8xf32> -> vector<32x8xf32>
    %35 = arith.addf %33, %34 : vector<32x8xf32>
    %cst_11 = arith.constant dense<0.000000e+00> : vector<32x8xf32>
    %36 = tpu.matmul %14, %27, %cst_11 {dimension_numbers = #tpu.dot_dimension_numbers<[1], [0], [0], [1], [0, 0, 1, 1], [], []>} : vector<32x16xbf16>, vector<16x8xbf16>, vector<32x8xf32> -> vector<32x8xf32>
    %37 = arith.addf %35, %36 : vector<32x8xf32>
    %cst_12 = arith.constant dense<0.000000e+00> : vector<32xf32>
    %38 = vector.multi_reduction <add>, %32, %cst_12 [1] : vector<32x8xf32> to vector<32xf32>
    %39 = vector.shape_cast %38 : vector<32xf32> to vector<32x1xf32>
    %cst_13 = arith.constant dense<0.000000e+00> : vector<32xf32>
    %40 = vector.multi_reduction <add>, %37, %cst_13 [1] : vector<32x8xf32> to vector<32xf32>
    %41 = vector.shape_cast %40 : vector<32xf32> to vector<32x1xf32>
    %42 = arith.addf %39, %41 : vector<32x1xf32>
    %cst_14 = arith.constant 1.600000e+01 : f32
    %43 = vector.broadcast %cst_14 : f32 to vector<32x1xf32>
    %44 = arith.divf %42, %43 : vector<32x1xf32>
    %45 = vector.broadcast %44 : vector<32x1xf32> to vector<32x8xf32>
    %46 = arith.subf %32, %45 : vector<32x8xf32>
    %47 = vector.broadcast %44 : vector<32x1xf32> to vector<32x8xf32>
    %48 = arith.subf %37, %47 : vector<32x8xf32>
    %49 = arith.mulf %46, %46 : vector<32x8xf32>
    %cst_15 = arith.constant dense<0.000000e+00> : vector<32xf32>
    %50 = vector.multi_reduction <add>, %49, %cst_15 [1] : vector<32x8xf32> to vector<32xf32>
    %51 = vector.shape_cast %50 : vector<32xf32> to vector<32x1xf32>
    %52 = arith.mulf %48, %48 : vector<32x8xf32>
    %cst_16 = arith.constant dense<0.000000e+00> : vector<32xf32>
    %53 = vector.multi_reduction <add>, %52, %cst_16 [1] : vector<32x8xf32> to vector<32xf32>
    %54 = vector.shape_cast %53 : vector<32xf32> to vector<32x1xf32>
    %55 = arith.addf %51, %54 : vector<32x1xf32>
    %cst_17 = arith.constant 1.600000e+01 : f32
    %56 = vector.broadcast %cst_17 : f32 to vector<32x1xf32>
    %57 = arith.divf %55, %56 : vector<32x1xf32>
    %cst_18 = arith.constant 9.99999974E-6 : f32
    %58 = vector.broadcast %cst_18 : f32 to vector<32x1xf32>
    %59 = arith.addf %57, %58 : vector<32x1xf32>
    %60 = math.rsqrt %59 : vector<32x1xf32>
    %61 = vector.broadcast %60 : vector<32x1xf32> to vector<32x8xf32>
    %62 = arith.mulf %46, %61 : vector<32x8xf32>
    %c0_19 = arith.constant 0 : index
    %c0_20 = arith.constant 0 : index
    %63 = vector.load %arg5[%c0_19, %c0_20] : memref<1x8xf32, #tpu.memory_space<vmem>>, vector<1x8xf32>
    %64 = vector.broadcast %63 : vector<1x8xf32> to vector<32x8xf32>
    %65 = arith.mulf %62, %64 : vector<32x8xf32>
    %c0_21 = arith.constant 0 : index
    %c0_22 = arith.constant 0 : index
    %66 = vector.load %arg7[%c0_21, %c0_22] : memref<1x8xf32, #tpu.memory_space<vmem>>, vector<1x8xf32>
    %67 = vector.broadcast %66 : vector<1x8xf32> to vector<32x8xf32>
    %68 = arith.addf %65, %67 : vector<32x8xf32>
    %69 = vector.broadcast %60 : vector<32x1xf32> to vector<32x8xf32>
    %70 = arith.mulf %48, %69 : vector<32x8xf32>
    %c0_23 = arith.constant 0 : index
    %c0_24 = arith.constant 0 : index
    %71 = vector.load %arg6[%c0_23, %c0_24] : memref<1x8xf32, #tpu.memory_space<vmem>>, vector<1x8xf32>
    %72 = vector.broadcast %71 : vector<1x8xf32> to vector<32x8xf32>
    %73 = arith.mulf %70, %72 : vector<32x8xf32>
    %c0_25 = arith.constant 0 : index
    %c0_26 = arith.constant 0 : index
    %74 = vector.load %arg8[%c0_25, %c0_26] : memref<1x8xf32, #tpu.memory_space<vmem>>, vector<1x8xf32>
    %75 = vector.broadcast %74 : vector<1x8xf32> to vector<32x8xf32>
    %76 = arith.addf %73, %75 : vector<32x8xf32>
    %c0_27 = arith.constant 0 : index
    %c0_28 = arith.constant 0 : index
    %77 = vector.load %arg9[%c0_27, %c0_28] : memref<8x64xf32, #tpu.memory_space<vmem>>, vector<8x64xf32>
    %cst_29 = arith.constant dense<0.000000e+00> : vector<32x64xf32>
    %78 = tpu.matmul %68, %77, %cst_29 {dimension_numbers = #tpu.dot_dimension_numbers<[1], [0], [0], [1], [0, 0, 1, 1], [], []>} : vector<32x8xf32>, vector<8x64xf32>, vector<32x64xf32> -> vector<32x64xf32>
    %c0_30 = arith.constant 0 : index
    %c0_31 = arith.constant 0 : index
    %79 = vector.load %arg10[%c0_30, %c0_31] : memref<8x64xf32, #tpu.memory_space<vmem>>, vector<8x64xf32>
    %cst_32 = arith.constant dense<0.000000e+00> : vector<32x64xf32>
    %80 = tpu.matmul %76, %79, %cst_32 {dimension_numbers = #tpu.dot_dimension_numbers<[1], [0], [0], [1], [0, 0, 1, 1], [], []>} : vector<32x8xf32>, vector<8x64xf32>, vector<32x64xf32> -> vector<32x64xf32>
    %81 = arith.addf %78, %80 : vector<32x64xf32>
    %c0_33 = arith.constant 0 : index
    %c0_34 = arith.constant 0 : index
    %82 = vector.load %arg11[%c0_33, %c0_34] : memref<1x64xf32, #tpu.memory_space<vmem>>, vector<1x64xf32>
    %83 = vector.broadcast %82 : vector<1x64xf32> to vector<32x64xf32>
    %84 = arith.addf %81, %83 : vector<32x64xf32>
    %cst_35 = arith.constant 0.000000e+00 : f32
    %85 = vector.broadcast %cst_35 : f32 to vector<32x64xf32>
    %86 = arith.maximumf %84, %85 : vector<32x64xf32>
    %c0_36 = arith.constant 0 : index
    %c0_37 = arith.constant 0 : index
    %87 = vector.load %arg12[%c0_36, %c0_37] : memref<64x1xf32, #tpu.memory_space<vmem>>, vector<64x1xf32>
    %cst_38 = arith.constant dense<0.000000e+00> : vector<32x1xf32>
    %88 = tpu.matmul %86, %87, %cst_38 {dimension_numbers = #tpu.dot_dimension_numbers<[1], [0], [0], [1], [0, 0, 1, 1], [], []>} : vector<32x64xf32>, vector<64x1xf32>, vector<32x1xf32> -> vector<32x1xf32>
    %c0_39 = arith.constant 0 : index
    %c0_40 = arith.constant 0 : index
    %89 = vector.load %arg13[%c0_39, %c0_40] : memref<1x1xf32, #tpu.memory_space<vmem>>, vector<1x1xf32>
    %90 = vector.broadcast %89 : vector<1x1xf32> to vector<32x1xf32>
    %91 = arith.addf %88, %90 : vector<32x1xf32>
    %92 = arith.negf %91 : vector<32x1xf32>
    %93 = math.exp %92 : vector<32x1xf32>
    %cst_41 = arith.constant 1.000000e+00 : f32
    %94 = vector.broadcast %cst_41 : f32 to vector<32x1xf32>
    %95 = arith.addf %94, %93 : vector<32x1xf32>
    %96 = arith.divf %94, %95 : vector<32x1xf32>
    %c0_42 = arith.constant 0 : index
    %c0_43 = arith.constant 0 : index
    %97 = vector.load %arg4[%c0_42, %c0_43] : memref<32x1xf32, #tpu.memory_space<vmem>>, vector<32x1xf32>
    %98 = arith.cmpf olt, %97, %96 : vector<32x1xf32>
    %99 = arith.extui %98 : vector<32x1xi1> to vector<32x1xi32>
    %100 = arith.sitofp %99 : vector<32x1xi32> to vector<32x1xf32>
    %101 = arith.truncf %100 : vector<32x1xf32> to vector<32x1xbf16>
    %cst_44 = arith.constant dense<0.000000e+00> : vector<16x1xf32>
    %102 = tpu.matmul %20, %101, %cst_44 {dimension_numbers = #tpu.dot_dimension_numbers<[1], [0], [0], [1], [0, 0, 1, 1], [], []>} : vector<16x32xbf16>, vector<32x1xbf16>, vector<16x1xf32> -> vector<16x1xf32>
    %cst_45 = arith.constant 1.000000e+00 : f32
    %103 = vector.broadcast %cst_45 : f32 to vector<16x1xf32>
    %104 = arith.addf %103, %102 : vector<16x1xf32>
    %105 = math.rsqrt %104 : vector<16x1xf32>
    %106 = vector.broadcast %105 : vector<16x1xf32> to vector<16x8xf32>
    %107 = arith.mulf %106, %0 : vector<16x8xf32>
    %108 = arith.truncf %107 : vector<16x8xf32> to vector<16x8xbf16>
    %cst_46 = arith.constant dense<0.000000e+00> : vector<32x8xf32>
    %109 = tpu.matmul %9, %108, %cst_46 {dimension_numbers = #tpu.dot_dimension_numbers<[1], [0], [0], [1], [0, 0, 1, 1], [], []>} : vector<32x16xbf16>, vector<16x8xbf16>, vector<32x8xf32> -> vector<32x8xf32>
    %110 = vector.broadcast %100 : vector<32x1xf32> to vector<32x8xf32>
    %111 = arith.mulf %110, %109 : vector<32x8xf32>
    %112 = arith.truncf %111 : vector<32x8xf32> to vector<32x8xbf16>
    %cst_47 = arith.constant dense<0.000000e+00> : vector<16x8xf32>
    %113 = tpu.matmul %20, %112, %cst_47 {dimension_numbers = #tpu.dot_dimension_numbers<[1], [0], [0], [1], [0, 0, 1, 1], [], []>} : vector<16x32xbf16>, vector<32x8xbf16>, vector<16x8xf32> -> vector<16x8xf32>
    %114 = arith.addf %107, %113 : vector<16x8xf32>
    %115 = arith.truncf %114 : vector<16x8xf32> to vector<16x8xbf16>
    %c0_48 = arith.constant 0 : index
    %c0_49 = arith.constant 0 : index
    %116 = vector.load %arg14[%c0_48, %c0_49] : memref<8x128xbf16, #tpu.memory_space<vmem>>, vector<8x128xbf16>
    %cst_50 = arith.constant dense<0.000000e+00> : vector<16x128xf32>
    %117 = tpu.matmul %115, %116, %cst_50 {dimension_numbers = #tpu.dot_dimension_numbers<[1], [0], [0], [1], [0, 0, 1, 1], [], []>} : vector<16x8xbf16>, vector<8x128xbf16>, vector<16x128xf32> -> vector<16x128xf32>
    %118 = vector.broadcast %105 : vector<16x1xf32> to vector<16x128xf32>
    %119 = arith.mulf %118, %117 : vector<16x128xf32>
    %c0_51 = arith.constant 0 : index
    %c0_52 = arith.constant 0 : index
    %120 = vector.load %arg15[%c0_51, %c0_52] : memref<1x128xf32, #tpu.memory_space<vmem>>, vector<1x128xf32>
    %121 = vector.broadcast %120 : vector<1x128xf32> to vector<16x128xf32>
    %122 = arith.addf %119, %121 : vector<16x128xf32>
    %c0_53 = arith.constant 0 : index
    %c0_54 = arith.constant 0 : index
    %123 = vector.load %arg16[%c0_53, %c0_54] : memref<16x128xf32, #tpu.memory_space<vmem>>, vector<16x128xf32>
    tpu.vector_store %arg16[%c0_53, %c0_54], %122 {strides = array<i32>} : memref<16x128xf32, #tpu.memory_space<vmem>>, vector<16x128xf32>,
    return
  }
}

</mosaic_0001>

<bundles_post_ra>
// kernel: tpu_custom_call.1
= control target key start
LH: loop header
LB: loop body
LE: loop exit
PB: predicated region body
PF: predicated region fallthrough
CT: control target
= control target key end

     0   :  { %s1891_s0 = inlined_call_operand.vmem [shape: f32[16,8], index: 0, kind: input, shape index: {}]   ;;  %s1892_s1 = inlined_call_operand.vmem [shape: s32[32,1], index: 1, kind: input, shape index: {}]   ;;  %s1893_s2 = inlined_call_operand.vmem [shape: s32[32,1], index: 2, kind: input, shape index: {}]   ;;  %s1894_s3 = inlined_call_operand.vmem [shape: s32[1,32], index: 3, kind: input, shape index: {}]   ;;  %s1895_s4 = inlined_call_operand.vmem [shape: f32[32,1], index: 4, kind: input, shape index: {}]   ;;  %s1896_s5 = inlined_call_operand.vmem [shape: f32[1,8], index: 5, kind: input, shape index: {}]   ;;  %s1897_s6 = inlined_call_operand.vmem [shape: f32[1,8], index: 6, kind: input, shape index: {}]   ;;  %s1898_s7 = inlined_call_operand.vmem [shape: f32[1,8], index: 7, kind: input, shape index: {}]   ;;  %s1899_s8 = inlined_call_operand.vmem [shape: f32[1,8], index: 8, kind: input, shape index: {}]   ;;  %s1900_s9 = inlined_call_operand.vmem [shape: f32[8,64], index: 9, kind: input, shape index: {}]   ;;  %s1901_s10 = inlined_call_operand.vmem [shape: f32[8,64], index: 10, kind: input, shape index: {}]   ;;  %s1902_s11 = inlined_call_operand.vmem [shape: f32[1,64], index: 11, kind: input, shape index: {}]   ;;  %s1903_s12 = inlined_call_operand.vmem [shape: f32[64,1], index: 12, kind: input, shape index: {}]   ;;  %s1904_s13 = inlined_call_operand.<no memory space> [shape: f32[1,1], index: 13, kind: input, shape index: {}]   ;;  %s1905_s14 = inlined_call_operand.vmem [shape: bf16[8,128], index: 14, kind: input, shape index: {}]   ;;  %s1906_s15 = inlined_call_operand.vmem [shape: f32[1,128], index: 15, kind: input, shape index: {}]   ;;  %s1907_s16 = inlined_call_operand.hbm [shape: f32[16,128], index: 16, kind: output, shape index: {}]  }
   0x1   :  { %1909 = sst [smem:[#allocation6_spill]] %s1891_s0  ;;  %v21_v0 = vstv %s1904_s13 }
   0x2   :  { %22 = vst [vmem:[#allocation2] sm:$0x1] %v21_v0 }
   0x3   :  { %v63_v1 = vld [vmem:[%s1893_s2] sm:$0xff]  ;;  %v1546_v3 = vmov 0   ;;  %v64_v4 = vld [vmem:[%s1893_s2 + $0x8] sm:$0xff]  ;;  %s1910_s30 = sld [smem:[#allocation6_spill]] }
   0x4   :  { %v59_v2 = vld [vmem:[%s1892_s1] sm:$0xff]  ;;  %1483 = vset.pattern.permute.xlu1 %v1546_v3  ;;  %1482 = vset.pattern.permute.xlu0 %v1546_v3  ;;  %v60_v6 = vld [vmem:[%s1892_s1 + $0x8] sm:$0xff] }
   0x5   :  { %97 = vperm.xlu1 %1483, %v63_v1   ;;  %71 = vperm.xlu0 %1482, %v59_v2  }
   0x9   :  { %v1653_v5 = vld [vmem:[%s1910_s30] sm:$0xff]  ;;  %v1661_v7 = vld [vmem:[%s1910_s30 + $0x8] sm:$0xff] }
   0xa   :  { %23 = vsyncpa [#allocation4], 0  ;;  %v1665_v8 = vpack.c.bf16 %v1661_v7, %v1653_v5  ;;  %100 = vperm.xlu1 %1483, %v64_v4   ;;  %74 = vperm.xlu0 %1482, %v60_v6   ;;  %v62_v11 = vld [vmem:[%s1892_s1 + $0x18] sm:$0xff]  ;;  %v61_v12 = vld [vmem:[%s1892_s1 + $0x10] sm:$0xff]  ;;  %v68_v23 = vlaneseq  ;;  %vm147_vm4 = vcmask 130048   ;;  %v1547_v29 = vmov 0.0  }
   0xb   :  { %v66_v16 = vld [vmem:[%s1893_s2 + $0x18] sm:$0xff]  ;;  %v65_v17 = vld [vmem:[%s1893_s2 + $0x10] sm:$0xff]  ;;  %vm462_vm9 = vcmask 64512   ;;  %vm830_vm10 = vcmask 523264   ;;  %vm1548_vm11 = vmmov 0  }
   0xc   :  { %v137_v9 = vunpack.c.l.bf16 %v1665_v8  ;;  %v138_v10 = vunpack.c.h.bf16 %v1665_v8  ;;  %v69_v24 = vand.u32 127, %v68_v23 }
   0xe   :  { %v139_v13 = vsub.f32 %v1653_v5, %v137_v9  ;;  %v140_v14 = vsub.f32 %v1661_v7, %v138_v10  ;;  %80 = vperm.xlu1 %1483, %v62_v11   ;;  %77 = vperm.xlu0 %1482, %v61_v12  }
  0x10   :  { %v141_v15 = vpack.c.bf16 %v140_v14, %v139_v13 }
  0x12   :  { %1337 = vmatprep.subr.bf16.mxu0 %v141_v15  ;;  %1355 = vmatprep.subr.bf16.mxu1 %v141_v15  ;;  %v142_v18 = vunpack.c.l.bf16 %v141_v15  ;;  %v143_v19 = vunpack.c.h.bf16 %v141_v15 }
  0x13   :  { %1338 = vmatpush3.bf16.msra.mxu0 %v141_v15  ;;  %1356 = vmatpush3.bf16.msra.mxu1 %v141_v15 }
  0x14   :  { %106 = vperm.xlu1 %1483, %v66_v16   ;;  %103 = vperm.xlu0 %1482, %v65_v17   ;;  %v144_v20 = vsub.f32 %v139_v13, %v142_v18  ;;  %v145_v21 = vsub.f32 %v140_v14, %v143_v19 }
  0x15   :  { %1343 = vmatprep.subr.bf16.mxu0 %v1665_v8  ;;  %1361 = vmatprep.subr.bf16.mxu1 %v1665_v8 }
  0x16   :  { %v146_v22 = vpack.c.bf16 %v145_v21, %v144_v20 }
  0x84   :  { %v98_v25 = vpop.permute.xlu1 %97  ;;  %v72_v26 = vpop.permute.xlu0 %71 }
  0x85   :  { %vm108_vm0 = vcmp.eq.s32.totalorder %v69_v24, %v98_v25  ;;  %vm82_vm1 = vcmp.eq.s32.totalorder %v69_v24, %v72_v26 }
  0x86   :  { %v1231_v30 = vsel %vm108_vm0, 1.0, %v1547_v29  ;;  %v1227_v31 = vsel %vm82_vm1, 1.0, %v1547_v29 }
  0x89   :  { %v101_v27 = vpop.permute.xlu1 %100  ;;  %v75_v28 = vpop.permute.xlu0 %74 }
  0x8a   :  { %vm109_vm2 = vcmp.eq.s32.totalorder %v69_v24, %v101_v27  ;;  %vm83_vm3 = vcmp.eq.s32.totalorder %v69_v24, %v75_v28 }
  0x8b   :  { %v1232_v32 = vsel %vm109_vm2, 1.0, %v1547_v29  ;;  %v1228_v33 = vsel %vm83_vm3, 1.0, %v1547_v29 }
  0x8c   :  { %v120_v34 = vpack.c.bf16 %v1232_v32, %v1231_v30  ;;  %v1690_v35 = vpack.c.bf16 %v1228_v33, %v1227_v31 }
  0x8d   :  { %v81_v36 = vpop.permute.xlu1 %80  ;;  %v78_v37 = vpop.permute.xlu0 %77 }
  0x8e   :  { %vm85_vm5 = vcmp.eq.s32.totalorder %v69_v24, %v81_v36  ;;  %vm84_vm6 = vcmp.eq.s32.totalorder %v69_v24, %v78_v37  ;;  %1339 = vmatprep.mubr.msk.bf16.mxu0 %vm147_vm4, %v1690_v35  ;;  %1357 = vmatprep.mubr.msk.bf16.mxu1 %vm147_vm4, %v120_v34 }
  0x8f   :  { %v1230_v38 = vsel %vm85_vm5, 1.0, %v1547_v29  ;;  %v1229_v39 = vsel %vm84_vm6, 1.0, %v1547_v29  ;;  %vm970_vm5 = vcmask 261120  }
  0x90   :  { %v1697_v40 = vpack.c.bf16 %v1230_v38, %v1229_v39 }
  0x92   :  { %1340 = vmatmul.mubr.msk.bf16.vlgmr.msra.gmra.mrb[0].mxu0 %vm147_vm4, %v1697_v40 }
  0x93   :  { %v107_v41 = vpop.permute.xlu1 %106  ;;  %v104_v42 = vpop.permute.xlu0 %103  ;;  %1345 = vmatprep.mubr.msk.bf16.mxu0 %vm147_vm4, %v1690_v35  ;;  %1344 = vmatpush3.bf16.msra.mxu0 %v1665_v8 }
  0x94   :  { %vm111_vm7 = vcmp.eq.s32.totalorder %v69_v24, %v107_v41  ;;  %vm110_vm8 = vcmp.eq.s32.totalorder %v69_v24, %v104_v42  ;;  %1349 = vmatprep.subr.bf16.mxu0 %v146_v22 }
  0x95   :  { %v1234_v43 = vsel %vm111_vm7, 1.0, %v1547_v29  ;;  %v1233_v44 = vsel %vm110_vm8, 1.0, %v1547_v29 }
  0x96   :  { %v121_v45 = vpack.c.bf16 %v1234_v43, %v1233_v44  ;;  %v605_v44 = vld [vmem:[%s1901_s10] sm:$0xff] }
  0x98   :  { %1358 = vmatmul.mubr.msk.bf16.vlgmr.msra.gmra.mrb[0].mxu1 %vm147_vm4, %v121_v45 }
  0x99   :  { %1363 = vmatprep.mubr.msk.bf16.mxu1 %vm147_vm4, %v120_v34  ;;  %1362 = vmatpush3.bf16.msra.mxu1 %v1665_v8 }
  0x9a   :  { %1367 = vmatprep.subr.bf16.mxu1 %v146_v22 }
  0x9e   :  { %1346 = vmatmul.mubr.msk.bf16.vlgmr.msra.gmra.mrb[0].mxu0 %vm147_vm4, %v1697_v40 }
  0x9f   :  { %1351 = vmatprep.mubr.msk.bf16.mxu0 %vm147_vm4, %v1690_v35  ;;  %1350 = vmatpush3.bf16.msra.mxu0 %v146_v22 }
  0xa0   :  { %1373 = vmatprep.subr.mxu0 %v605_v44 }
  0xa4   :  { %1364 = vmatmul.mubr.msk.bf16.vlgmr.msra.gmra.mrb[0].mxu1 %vm147_vm4, %v121_v45 }
  0xa5   :  { %1369 = vmatprep.mubr.msk.bf16.mxu1 %vm147_vm4, %v120_v34  ;;  %1368 = vmatpush3.bf16.msra.mxu1 %v146_v22 }
  0xaa   :  { %1352 = vmatmul.mubr.msk.bf16.vlgmr.msra.gmra.mrb[0].mxu0 %vm147_vm4, %v1697_v40 }
  0xab   :  { %1374 = vmatpush3.msra.mxu0 %v605_v44 }
  0xb0   :  { %1370 = vmatmul.mubr.msk.bf16.vlgmr.msra.gmra.mrb[0].mxu1 %vm147_vm4, %v121_v45  ;;  %v1772_v45 = vld [vmem:[%s1900_s9] sm:$0xff] }
  0xb1   :  { %1381 = vmatprep.subr.mxu0 %v1772_v45 }
 0x17d   :  { %v1353_v46 = vpop.f32.mrb[0].mxu0 }
 0x17e   :  { %v286_v47 = vpop.f32.mrb[1].mxu0  ;;  %v469_v57 = vsel %vm462_vm9, %v1353_v46, 0.0 }
 0x17f   :  { %v1354_v48 = vpop.f32.mrb[2].mxu0  ;;  %v463_v49 = vsel %vm462_vm9, %v286_v47, 0.0 }
 0x180   :  { %464 = vadd.xlane.f32.xlu0 %v463_v49  ;;  %v289_v50 = vpop.f32.mrb[3].mxu0  ;;  %v472_v59 = vsel %vm462_vm9, %v1354_v48, 0.0 }
 0x181   :  { %v466_v58 = vsel %vm462_vm9, %v289_v50, 0.0 }
 0x183   :  { %v1371_v51 = vpop.f32.mrb[0].mxu1 }
 0x184   :  { %v443_v52 = vpop.f32.mrb[1].mxu1  ;;  %v481_v53 = vsel %vm462_vm9, %v1371_v51, 0.0 }
 0x185   :  { %v1372_v54 = vpop.f32.mrb[2].mxu1  ;;  %v475_v55 = vsel %vm462_vm9, %v443_v52, 0.0  ;;  %482 = vadd.xlane.f32.xlu0 %v481_v53  ;;  %v820_v53 = vld [vmem:[%s1903_s12 + $0x28] sm:$0xff] }
 0x186   :  { %476 = vadd.xlane.f32.xlu1 %v475_v55  ;;  %v446_v56 = vpop.f32.mrb[3].mxu1  ;;  %v484_v61 = vsel %vm462_vm9, %v1372_v54, 0.0 }
 0x187   :  { %v478_v60 = vsel %vm462_vm9, %v446_v56, 0.0 }
 0x189   :  { %467 = vadd.xlane.f32.xlu0 %v466_v58 }
 0x18a   :  { %470 = vadd.xlane.f32.xlu1 %v469_v57 }
 0x18d   :  { %479 = vadd.xlane.f32.xlu0 %v478_v60 }
 0x18e   :  { %473 = vadd.xlane.f32.xlu1 %v472_v59 }
 0x191   :  { %485 = vadd.xlane.f32.xlu0 %v484_v61 }
 0x20d   :  { %v465_v62 = vpop.xlane.xlu0 %464 }
 0x212   :  { %v483_v0 = vpop.xlane.xlu0 %482 }
 0x213   :  { %v477_v63 = vpop.xlane.xlu1 %476 }
 0x214   :  { %v487_v1 = vadd.f32 %v477_v63, %v465_v62 }
 0x216   :  { %v468_v3 = vpop.xlane.xlu0 %467  ;;  %v492_v4 = vmul.f32 0.0625, %v487_v1 }
 0x217   :  { %v471_v2 = vpop.xlane.xlu1 %470 }
 0x218   :  { %v489_v6 = vadd.f32 %v483_v0, %v471_v2  ;;  %v1726_v10 = vsub.f32 %v286_v47, %v492_v4  ;;  %v1732_v14 = vsub.f32 %v443_v52, %v492_v4  ;;  %v816_v47 = vld [vmem:[%s1903_s12 + $0x8] sm:$0xff]  ;;  %v819_v52 = vld [vmem:[%s1903_s12 + $0x20] sm:$0xff] }
 0x21a   :  { %v494_v8 = vmul.f32 0.0625, %v489_v6  ;;  %v480_v9 = vpop.xlane.xlu0 %479  ;;  %v504_v24 = vmul.f32 %v1726_v10, %v1726_v10  ;;  %v520_v27 = vmul.f32 %v1732_v14, %v1732_v14 }
 0x21b   :  { %v488_v13 = vadd.f32 %v480_v9, %v468_v3  ;;  %v474_v18 = vpop.xlane.xlu1 %473 }
 0x21c   :  { %v1728_v11 = vsub.f32 %v1353_v46, %v494_v8  ;;  %v1730_v12 = vsub.f32 %v1371_v51, %v494_v8  ;;  %v508_v31 = vsel %vm462_vm9, %v504_v24, 0.0  ;;  %v524_v34 = vsel %vm462_vm9, %v520_v27, 0.0  ;;  %v815_v46 = vld [vmem:[%s1903_s12] sm:$0xff] }
 0x21d   :  { %v493_v15 = vmul.f32 0.0625, %v488_v13  ;;  %v1439_v49 = vpack.c.bf16 %v816_v47, %v815_v46  ;;  %v1253_v27 = vld [vmem:[%s1899_s8] ss:$0 sm:$0xff] }
 0x21e   :  { %v506_v16 = vmul.f32 %v1728_v11, %v1728_v11  ;;  %v522_v17 = vmul.f32 %v1730_v12, %v1730_v12  ;;  %v486_v19 = vpop.xlane.xlu0 %485 }
 0x21f   :  { %v1738_v20 = vsub.f32 %v289_v50, %v493_v15  ;;  %v490_v21 = vadd.f32 %v486_v19, %v474_v18  ;;  %v1743_v25 = vsub.f32 %v446_v56, %v493_v15  ;;  %v818_v50 = vld [vmem:[%s1903_s12 + $0x18] sm:$0xff]  ;;  %1440 = vmatprep.subr.bf16.mxu1 %v1439_v49 }
 0x220   :  { %v514_v22 = vsel %vm462_vm9, %v506_v16, 0.0  ;;  %v530_v26 = vsel %vm462_vm9, %v522_v17, 0.0  ;;  %1442 = vmatpush3.bf16.msra.mxu1 %v1439_v49 }
 0x221   :  { %515 = vadd.xlane.f32.xlu1 %v514_v22  ;;  %v495_v28 = vmul.f32 0.0625, %v490_v21  ;;  %531 = vadd.xlane.f32.xlu0 %v530_v26  ;;  %v505_v32 = vmul.f32 %v1738_v20, %v1738_v20  ;;  %v521_v36 = vmul.f32 %v1743_v25, %v1743_v25  ;;  %v1252_v21 = vld [vmem:[%s1897_s6] ss:$0 sm:$0xff] }
 0x223   :  { %v1748_v30 = vsub.f32 %v1354_v48, %v495_v28  ;;  %v1753_v33 = vsub.f32 %v1372_v54, %v495_v28  ;;  %v511_v37 = vsel %vm462_vm9, %v505_v32, 0.0  ;;  %v527_v39 = vsel %vm462_vm9, %v521_v36, 0.0  ;;  %v817_v48 = vld [vmem:[%s1903_s12 + $0x10] sm:$0xff] }
 0x224   :  { %v1443_v51 = vpack.c.bf16 %v818_v50, %v817_v48  ;;  %v1447_v54 = vpack.c.bf16 %v820_v53, %v819_v52  ;;  %v822_v50 = vld [vmem:[%s1903_s12 + $0x38] sm:$0xff]  ;;  %v1262_v52 = vld [vmem:[%s1902_s11] ss:$0 sm:$0xff] }
 0x225   :  { %509 = vadd.xlane.f32.xlu1 %v508_v31  ;;  %525 = vadd.xlane.f32.xlu0 %v524_v34  ;;  %v507_v38 = vmul.f32 %v1748_v30, %v1748_v30  ;;  %v523_v41 = vmul.f32 %v1753_v33, %v1753_v33 }
 0x226   :  { %1444 = vmatprep.subr.bf16.mxu1 %v1443_v51 }
 0x227   :  { %v517_v42 = vsel %vm462_vm9, %v507_v38, 0.0  ;;  %v533_v43 = vsel %vm462_vm9, %v523_v41, 0.0  ;;  %1446 = vmatpush3.bf16.msra.mxu1 %v1443_v51 }
 0x228   :  { %1448 = vmatprep.subr.bf16.mxu1 %v1447_v54 }
 0x229   :  { %512 = vadd.xlane.f32.xlu1 %v511_v37  ;;  %528 = vadd.xlane.f32.xlu0 %v527_v39  ;;  %v1250_v39 = vld [vmem:[%s1896_s5] ss:$0 sm:$0xff] }
 0x22b   :  { %1450 = vmatpush3.bf16.msra.mxu1 %v1447_v54 }
 0x22d   :  { %518 = vadd.xlane.f32.xlu1 %v517_v42  ;;  %534 = vadd.xlane.f32.xlu0 %v533_v43 }
 0x2ae   :  { %v516_v55 = vpop.xlane.xlu1 %515  ;;  %v532_v56 = vpop.xlane.xlu0 %531 }
 0x2af   :  { %v538_v57 = vadd.f32 %v532_v56, %v516_v55 }
 0x2b1   :  { %v542_v58 = vmul.f32 0.0625, %v538_v57 }
 0x2b2   :  { %v510_v59 = vpop.xlane.xlu1 %509  ;;  %v526_v60 = vpop.xlane.xlu0 %525 }
 0x2b3   :  { %v536_v61 = vadd.f32 %v526_v60, %v510_v59  ;;  %v546_v62 = vadd.f32 1e-05, %v542_v58 }
 0x2b5   :  { %v540_v63 = vmul.f32 0.0625, %v536_v61  ;;  %1494 = vrsqrt.f32 %v546_v62 }
 0x2b6   :  { %v513_v0 = vpop.xlane.xlu1 %512  ;;  %v529_v1 = vpop.xlane.xlu0 %528 }
 0x2b7   :  { %v544_v2 = vadd.f32 1e-05, %v540_v63  ;;  %v537_v3 = vadd.f32 %v529_v1, %v513_v0  ;;  %v1263_v1 = vld [vmem:[#allocation2] ss:$0 sm:$0xff] }
 0x2b9   :  { %1496 = vrsqrt.f32 %v544_v2  ;;  %v541_v4 = vmul.f32 0.0625, %v537_v3 }
 0x2ba   :  { %v519_v6 = vpop.xlane.xlu1 %518  ;;  %v535_v8 = vpop.xlane.xlu0 %534 }
 0x2bb   :  { %v545_v9 = vadd.f32 1e-05, %v541_v4  ;;  %v539_v13 = vadd.f32 %v535_v8, %v519_v6 }
 0x2bd   :  { %1498 = vrsqrt.f32 %v545_v9  ;;  %v543_v15 = vmul.f32 0.0625, %v539_v13 }
 0x2bf   :  { %v547_v16 = vadd.f32 1e-05, %v543_v15  ;;  %v1495_v17 = vpop.eup %1494 }
 0x2c0   :  { %v580_v22 = vmul.f32 %v1495_v17, %v1730_v12 }
 0x2c1   :  { %1500 = vrsqrt.f32 %v547_v16 }
 0x2c2   :  { %v591_v32 = vmul.f32 %v1252_v21, %v580_v22 }
 0x2c3   :  { %v1497_v18 = vpop.eup %1496 }
 0x2c4   :  { %v578_v19 = vmul.f32 %v1497_v18, %v1732_v14  ;;  %v552_v34 = vmul.f32 %v1497_v18, %v1726_v10  ;;  %v602_v41 = vadd.f32 %v1253_v27, %v591_v32  ;;  %v123_v32 = vshrl.u32 %v68_v23, 7  ;;  %v955_v23 = vld [vmem:[%s1895_s4 + $0x18] sm:$0xff] }
 0x2c6   :  { %v589_v24 = vmul.f32 %v1252_v21, %v578_v19  ;;  %v563_v42 = vmul.f32 %v1250_v39, %v552_v34  ;;  %v124_v34 = vadd.s32 8, %v123_v32 }
 0x2c7   :  { %v1499_v26 = vpop.eup %1498 }
 0x2c8   :  { %v579_v28 = vmul.f32 %v1499_v26, %v1743_v25  ;;  %v600_v31 = vadd.f32 %v1253_v27, %v589_v24  ;;  %v553_v37 = vmul.f32 %v1499_v26, %v1738_v20  ;;  %v554_v25 = vmul.f32 %v1495_v17, %v1728_v11 }
 0x2ca   :  { %1375 = vmatprep.mubr.msk.f32.mxu0 %vm462_vm9, %v600_v31  ;;  %v590_v14 = vmul.f32 %v1252_v21, %v579_v28  ;;  %v564_v20 = vmul.f32 %v1250_v39, %v553_v37  ;;  %v565_v47 = vmul.f32 %v1250_v39, %v554_v25  ;;  %v952_v37 = vld [vmem:[%s1895_s4] sm:$0xff] }
 0x2cb   :  { %v1501_v36 = vpop.eup %1500 }
 0x2cc   :  { %v601_v38 = vadd.f32 %v1253_v27, %v590_v14  ;;  %v581_v12 = vmul.f32 %v1501_v36, %v1753_v33  ;;  %v1251_v33 = vld [vmem:[%s1898_s7] ss:$0 sm:$0xff]  ;;  %v555_v44 = vmul.f32 %v1501_v36, %v1748_v30  ;;  %v821_v30 = vld [vmem:[%s1903_s12 + $0x30] sm:$0xff]  ;;  %v953_v14 = vld [vmem:[%s1895_s4 + $0x8] sm:$0xff] }
 0x2cd   :  { %v574_v46 = vadd.f32 %v1251_v33, %v563_v42  ;;  %v575_v11 = vadd.f32 %v1251_v33, %v564_v20  ;;  %v576_v49 = vadd.f32 %v1251_v33, %v565_v47  ;;  %v1451_v51 = vpack.c.bf16 %v822_v50, %v821_v30  ;;  %v1235_v36 = vld [vmem:[%s1894_s3] ss:$0 sm:$0xff] }
 0x2ce   :  { %1376 = vmatmul.mubr.msk.f32.vlgmr.msra.gmra.mrb[4].mxu0 %vm462_vm9, %v601_v38  ;;  %v592_v10 = vmul.f32 %v1252_v21, %v581_v12  ;;  %v566_v48 = vmul.f32 %v1250_v39, %v555_v44  ;;  %vm129_vm13 = vcmp.eq.s32.totalorder %v123_v32, %v1235_v36  ;;  %vm130_vm14 = vcmp.eq.s32.totalorder %v124_v34, %v1235_v36 }
 0x2cf   :  { %1378 = vmatprep.mubr.msk.f32.mxu0 %vm462_vm9, %v602_v41  ;;  %1382 = vmatpush3.msra.mxu0 %v1772_v45  ;;  %v954_v41 = vld [vmem:[%s1895_s4 + $0x10] sm:$0xff]  ;;  %v1237_v20 = vsel %vm130_vm14, 1.0, %v1547_v29 }
 0x2d0   :  { %v603_v43 = vadd.f32 %v1253_v27, %v592_v10  ;;  %1411 = vmatprep.subr.bf16.mxu0 %v1547_v29  ;;  %v577_v45 = vadd.f32 %v1251_v33, %v566_v48  ;;  %1452 = vmatprep.subr.bf16.mxu1 %v1451_v51  ;;  %v1549_v10 = vmov 1.0|1.0  }
 0x2d1   :  { %1454 = vmatpush3.bf16.msra.mxu1 %v1451_v51 }
 0x2d2   :  { %1379 = vmatmul.mubr.msk.f32.gmra.mrb[6].mxu0 %vm462_vm9, %v603_v43  ;;  %v1236_v43 = vsel %vm129_vm13, 1.0, %v1547_v29 }
 0x2d3   :  { %1383 = vmatprep.mubr.msk.f32.mxu0 %vm462_vm9, %v574_v46  ;;  %v135_v47 = vpack.c.bf16 %v1237_v20, %v1236_v43 }
 0x2d6   :  { %1384 = vmatmul.mubr.msk.f32.vlgmr.msra.gmra.mrb[4].mxu0 %vm462_vm9, %v575_v11 }
 0x2d7   :  { %1386 = vmatprep.mubr.msk.f32.mxu0 %vm462_vm9, %v576_v49 }
 0x2da   :  { %1387 = vmatmul.mubr.msk.f32.gmra.mrb[6].mxu0 %vm462_vm9, %v577_v45 }
 0x2db   :  { %1415 = vmatprep.mubr.msk.bf16.mxu0 %vm1548_vm11, %v1547_v29 }
 0x3a9   :  { %v1385_v53 = vpop.f32.mrb[4].mxu0 }
 0x3aa   :  { %v808_v54 = vadd.f32 %v1385_v53, %v1262_v52  ;;  %v781_v55 = vpop.f32.mrb[5].mxu0 }
 0x3ab   :  { %v807_v56 = vadd.f32 %v1262_v52, %v781_v55 }
 0x3ac   :  { %v812_v59 = vmax.f32 %v808_v54, 0.0 }
 0x3ad   :  { %v811_v57 = vmax.f32 %v807_v56, 0.0  ;;  %v1388_v58 = vpop.f32.mrb[6].mxu0 }
 0x3ae   :  { %v810_v60 = vadd.f32 %v1388_v58, %v1262_v52  ;;  %v791_v61 = vpop.f32.mrb[7].mxu0 }
 0x3af   :  { %v809_v62 = vadd.f32 %v1262_v52, %v791_v61  ;;  %1405 = vmatprep.mubr.msk.f32.mxu1 %vm830_vm10, %v811_v57 }
 0x3b0   :  { %1406 = vmatmul.mubr.msk.f32.vlgmr.msra.gmra.mrb[4].mxu1 %vm830_vm10, %v812_v59  ;;  %v814_v0 = vmax.f32 %v810_v60, 0.0 }
 0x3b1   :  { %v813_v63 = vmax.f32 %v809_v62, 0.0 }
 0x3b3   :  { %1408 = vmatprep.mubr.msk.f32.mxu1 %vm830_vm10, %v813_v63 }
 0x3b4   :  { %1409 = vmatmul.mubr.msk.f32.gmra.mrb[6].mxu1 %vm830_vm10, %v814_v0 }
 0x3b5   :  { %1421 = vmatprep.mubr.msk.bf16.mxu1 %vm147_vm4, %v1690_v35 }
 0x483   :  { %v1407_v2 = vpop.f32.mrb[4].mxu1 }
 0x484   :  { %v915_v3 = vadd.f32 %v1407_v2, %v1263_v1  ;;  %v909_v4 = vpop.f32.mrb[5].mxu1 }
 0x485   :  { %v910_v6 = vadd.f32 %v1263_v1, %v909_v4 }
 0x486   :  { %v1269_v8 = vmul.f32 -1.442695, %v915_v3 }
 0x487   :  { %v1268_v9 = vmul.f32 -1.442695, %v910_v6  ;;  %v1410_v13 = vpop.f32.mrb[6].mxu1 }
 0x488   :  { %1502 = vpow2.f32 %v1269_v8  ;;  %v925_v15 = vadd.f32 %v1410_v13, %v1263_v1  ;;  %v919_v16 = vpop.f32.mrb[7].mxu1 }
 0x489   :  { %1504 = vpow2.f32 %v1268_v9  ;;  %v920_v17 = vadd.f32 %v1263_v1, %v919_v16 }
 0x48a   :  { %v1271_v18 = vmul.f32 -1.442695, %v925_v15 }
 0x48b   :  { %v1270_v19 = vmul.f32 -1.442695, %v920_v17 }
 0x48c   :  { %1506 = vpow2.f32 %v1271_v18 }
 0x48d   :  { %1508 = vpow2.f32 %v1270_v19 }
 0x492   :  { %v1503_v35 = vpop.eup %1502 }
 0x493   :  { %v1505_v21 = vpop.eup %1504  ;;  %v941_v22 = vadd.f32 1.0, %v1503_v35 }
 0x494   :  { %v940_v24 = vadd.f32 1.0, %v1505_v21 }
 0x495   :  { %1510 = vrcp.f32 %v941_v22 }
 0x496   :  { %v1507_v26 = vpop.eup %1506  ;;  %1512 = vrcp.f32 %v940_v24 }
 0x497   :  { %v1509_v27 = vpop.eup %1508  ;;  %v943_v28 = vadd.f32 1.0, %v1507_v26  ;;  %v1285_v26 = vld [vmem:[%s1906_s15] ss:$0 sm:$0xff] }
 0x498   :  { %v942_v31 = vadd.f32 1.0, %v1509_v27 }
 0x499   :  { %1514 = vrcp.f32 %v943_v28 }
 0x49a   :  { %1516 = vrcp.f32 %v942_v31 }
 0x49f   :  { %v1511_v38 = vpop.eup %1510 }
 0x4a0   :  { %v1513_v12 = vpop.eup %1512  ;;  %vm957_vm12 = vcmp.lt.f32.partialorder %v953_v14, %v1511_v38 }
 0x4a1   :  { %vm956_vm15 = vcmp.lt.f32.partialorder %v952_v37, %v1513_v12  ;;  %v1273_v39 = vsel %vm957_vm12, 1.0, %v1547_v29 }
 0x4a2   :  { %vm1276_vm0 = vmpackc.low %vm957_vm12, %vm956_vm15  ;;  %v1272_v42 = vsel %vm956_vm15, 1.0, %v1547_v29 }
 0x4a3   :  { %v1515_v25 = vpop.eup %1514  ;;  %1412 = vmatpush3.bf16.msk.msra.mxu0 %vm1276_vm0, %v1549_v10  ;;  %v1484_v33 = vpack.i.bf16 %v1273_v39, %v1272_v42 }
 0x4a4   :  { %v1517_v44 = vpop.eup %1516  ;;  %1413 = vmatprep.subr.bf16.mxu0 %v1547_v29  ;;  %vm959_vm1 = vcmp.lt.f32.partialorder %v955_v23, %v1515_v25 }
 0x4a5   :  { %vm958_vm2 = vcmp.lt.f32.partialorder %v954_v41, %v1517_v44  ;;  %v1275_v46 = vsel %vm959_vm1, 1.0, %v1547_v29 }
 0x4a6   :  { %vm1278_vm3 = vmpackc.low %vm959_vm1, %vm958_vm2  ;;  %v1274_v11 = vsel %vm958_vm2, 1.0, %v1547_v29 }
 0x4a7   :  { %1414 = vmatpush3.bf16.msk.msra.mxu0 %vm1278_vm3, %v1549_v10  ;;  %v1489_v48 = vpack.i.bf16 %v1275_v46, %v1274_v11 }
 0x4a8   :  { %1425 = vmatprep.subr.bf16.mxu0 %v1547_v29 }
 0x4aa   :  { %1416 = vmatmul.mubr.msk.bf16.vlgmr.msra.gmra.mrb[8].mxu0 %vm970_vm5, %v135_v47 }
 0x4ab   :  { %1429 = vmatprep.mubr.msk.bf16.mxu0 %vm1548_vm11, %v1547_v29 }
 0x57d   :  { %v1008_v49 = vpop.f32.mrb[8].mxu0 }
 0x57e   :  { %v1009_v45 = vadd.f32 1.0, %v1008_v49  ;;  %v1417_v30 = vpop.f32.mrb[9].mxu0 }
 0x57f   :  { %v1011_v50 = vpop.f32.mrb[10].mxu0 }
 0x580   :  { %1518 = vrsqrt.f32 %v1009_v45  ;;  %v1012_v51 = vadd.f32 1.0, %v1011_v50  ;;  %v1418_v52 = vpop.f32.mrb[11].mxu0 }
 0x582   :  { %1520 = vrsqrt.f32 %v1012_v51 }
 0x58a   :  { %v1519_v53 = vpop.eup %1518 }
 0x58b   :  { %1019 = vperm.xlu1 %1483, %v1519_v53  }
 0x58c   :  { %v1521_v54 = vpop.eup %1520 }
 0x58d   :  { %1024 = vperm.xlu0 %1482, %v1521_v54  }
 0x58f   :  { %1485 = vperm.xlu1 %1483, %v1484_v33  }
 0x593   :  { %1490 = vperm.xlu1 %1483, %v1489_v48  }
 0x60a   :  { %v1020_v55 = vpop.permute.xlu1 %1019 }
 0x60b   :  { %v1027_v57 = vmul.f32 %v1020_v55, %v1653_v5 }
 0x60c   :  { %v1025_v56 = vpop.permute.xlu0 %1024 }
 0x60d   :  { %v1028_v58 = vmul.f32 %v1025_v56, %v1661_v7 }
 0x60e   :  { %v1486_v60 = vpop.permute.xlu1 %1485 }
 0x60f   :  { %v1029_v59 = vpack.c.bf16 %v1028_v58, %v1027_v57  ;;  %v1488_v5 = vunpack.i.h.bf16 %v1486_v60  ;;  %v1487_v2 = vunpack.i.l.bf16 %v1486_v60 }
 0x611   :  { %1419 = vmatprep.subr.bf16.mxu1 %v1029_v59 }
 0x612   :  { %1420 = vmatpush3.bf16.msra.mxu1 %v1029_v59  ;;  %v1491_v61 = vpop.permute.xlu1 %1490 }
 0x613   :  { %1433 = vmatprep.subr.bf16.mxu1 %v1547_v29  ;;  %v1493_v63 = vunpack.i.h.bf16 %v1491_v61  ;;  %v1492_v0 = vunpack.i.l.bf16 %v1491_v61 }
 0x615   :  { %1422 = vmatmul.mubr.msk.bf16.vlgmr.msra.gmra.mrb[8].mxu1 %vm147_vm4, %v1697_v40  ;;  %v1149_v40 = vld [vmem:[%s1905_s14] sm:$0xf]  ;;  %vm1153_vm4 = vcmask 1043456   ;;  %s1550_s14 = smov [#allocation3]  }
 0x616   :  { %1435 = vmatprep.mubr.msk.bf16.mxu1 %vm1548_vm11, %v1547_v29  ;;  %v1155_v16 = vsel %vm1153_vm4, %v1149_v40, 0  ;;  %s1216_s24 = sshll.u32 %s1550_s14, 4  ;;  %s1217_s24 = int_to_ptr.vmem [resolvable:$true] %s1216_s24 }
 0x617   :  { %1434 = vmatpush3.bf16.msra.mxu1 %v1155_v16  ;;  %s1522_s25 = scalar_lea.vmem %s1217_s24, 256  ;;  %p1527_p1 = scmp.lt.s32.totalorder %s1217_s24, %s1217_s24 }
 0x618   :  { %p1523_p0 = scmp.ne.s32.totalorder %s1217_s24, %s1522_s25  ;;  %p1528_p2 = scmp.lt.s32.totalorder %s1522_s25, %s1522_s25 }
 0x61a   :  { %p1529_p3 = por %p1528_p2, %p1527_p1 }
 0x61c   :  { %p1530_p4 = pnand %p1529_p3, %p1523_p0 }
 0x6e8   :  { %v1423_v62 = vpop.f32.mrb[8].mxu1 }
 0x6e9   :  { %v1064_v1 = vpop.f32.mrb[9].mxu1  ;;  %v1101_v3 = vmul.f32 %v1492_v0, %v1423_v62 }
 0x6ea   :  { %v1424_v7 = vpop.f32.mrb[10].mxu1  ;;  %v1099_v8 = vmul.f32 %v1487_v2, %v1064_v1 }
 0x6eb   :  { %v1102_v4 = vmul.f32 %v1493_v63, %v1424_v7  ;;  %v1067_v6 = vpop.f32.mrb[11].mxu1 }
 0x6ec   :  { %v1100_v9 = vmul.f32 %v1488_v5, %v1067_v6 }
 0x6ed   :  { %v1104_v13 = vpack.c.bf16 %v1102_v4, %v1101_v3 }
 0x6ee   :  { %v1103_v15 = vpack.c.bf16 %v1100_v9, %v1099_v8 }
 0x6f0   :  { %1426 = vmatpush3.bf16.msra.mxu0 %v1103_v15 }
 0x6f1   :  { %1427 = vmatprep.subr.bf16.mxu0 %v1547_v29 }
 0x6f4   :  { %1428 = vmatpush3.bf16.msra.mxu0 %v1104_v13 }
 0x6f7   :  { %1430 = vmatmul.mubr.msk.bf16.vlgmr.msra.gmra.mrb[12].mxu0 %vm970_vm5, %v135_v47 }
 0x7ca   :  { %v1139_v17 = vpop.f32.mrb[12].mxu0 }
 0x7cb   :  { %v1431_v18 = vpop.f32.mrb[13].mxu0  ;;  %v1146_v35 = vadd.f32 %v1139_v17, %v1027_v57 }
 0x7cc   :  { %v1142_v19 = vpop.f32.mrb[14].mxu0 }
 0x7cd   :  { %v1147_v21 = vadd.f32 %v1142_v19, %v1028_v58  ;;  %v1432_v22 = vpop.f32.mrb[15].mxu0 }
 0x7cf   :  { %v1148_v24 = vpack.c.bf16 %v1147_v21, %v1146_v35 }
 0x7d1   :  { %1436 = vmatmul.mubr.msk.bf16.vlgmr.msra.gmra.mrb[12].mxu1 %vm462_vm9, %v1148_v24 }
 0x8a4   :  { %v1191_v29 = vpop.f32.mrb[12].mxu1 }
 0x8a5   :  { %v1198_v27 = vmul.f32 %v1191_v29, %v1020_v55  ;;  %v1437_v28 = vpop.f32.mrb[13].mxu1 }
 0x8a6   :  { %v1194_v31 = vpop.f32.mrb[14].mxu1 }
 0x8a7   :  { %v1207_v32 = vadd.f32 %v1285_v26, %v1198_v27  ;;  %v1199_v34 = vmul.f32 %v1194_v31, %v1025_v56  ;;  %v1438_v14 = vpop.f32.mrb[15].mxu1 }
 0x8a9   :  { %1209 = vst [vmem:[#allocation3] sm:$0xff] %v1207_v32  ;;  %v1208_v36 = vadd.f32 %v1285_v26, %v1199_v34 }
 0x8ab   :  { %1210 = vst [vmem:[#allocation3 + $0x8] sm:$0xff] %v1208_v36 }
 0x8ac   :  { %1533 = shalt.err (!%p1530_p4)
}
 0x8ad   :  { %s1534_s27 = scalar_lea.hbm %s1907_s16, 256 }
 0x8ae   :  { %p1535_p5 = scmp.ne.s32.totalorder %s1907_s16, %s1534_s27  ;;  %p1538_p6 = scmp.lt.u32.totalorder %s1534_s27, %s1907_s16 }
 0x8b0   :  { %p1540_p7 = pnand %p1538_p6, %p1535_p5 }
 0x8b2   :  { %1543 = shalt.err (!%p1540_p7)
}
 0x8b3   :  { %s1551_s5 = smov 128   ;;  %s1552_s7 = smov 8  }
 0x8b4   :  { %1222 = dma.vmem_to_hbm [thread:$0]  %s1217_s24, 256, %s1907_s16, [#allocation4], %s1551_s5, %s1551_s5, %s1552_s7  }
 0x8b5   :  { %1544 = dma.done.wait [#allocation4], 256  }
 0x8b6   :  { %1545 = vsyncadd [#allocation4], 4294967040 }
 0x8b7   :  { %1226 = vsyncpa [#allocation4], 1 }

</bundles_post_ra>
